<compile_context>
chip_gen: v7x
topology: tpu7x:2x2x1
jax: 0.10.0
libtpu: 0.0.40
codegen_flags: <defaults>
</compile_context>

<pallas_src>
import functools

import jax
import jax.numpy as jnp
from jax.experimental import pallas as pl
from jax.experimental.pallas import tpu as pltpu


def _pool_sum_kernel(x_ref, pool_ref):
    # x_ref: (1, hw_tile, C)   pool_ref: (1, 1, C) f32 accumulator (resident across t)
    t = pl.program_id(1)

    @pl.when(t == 0)
    def _():
        pool_ref[...] = jnp.zeros_like(pool_ref)

    pool_ref[...] += jnp.sum(x_ref[...].astype(jnp.float32), axis=1, keepdims=True)


def _excite_kernel(pool_ref, w1t_ref, b1_ref, w2t_ref, b2_ref, s_ref, *, inv_hw):
    # pool_ref: (N, 1, C) f32 spatial sums; weights pre-transposed in the wrapper.
    pooled = pool_ref[...][:, 0, :] * inv_hw                             # (N, C) mean
    h = jnp.dot(pooled, w1t_ref[...],
                preferred_element_type=jnp.float32) + b1_ref[...]        # (N, C//16)
    h = jnp.maximum(h, 0.0)
    z = jnp.dot(h, w2t_ref[...],
                preferred_element_type=jnp.float32) + b2_ref[...]        # (N, C)
    # Exact sigmoid: exp() runs on the EUP; the divide touches only N*C elements once
    # per forward, so it is off the streaming critical path (approx reciprocal would
    # trade ~1e-4 relative error for no measurable gain here).
    s = 1.0 / (1.0 + jnp.exp(-z))
    s_ref[...] = s[:, None, :].astype(s_ref.dtype)


def _scale_kernel(x_ref, s_ref, o_ref):
    # x_ref/o_ref: (1, hw_tile, C)   s_ref: (1, 1, C) per-channel gate
    o_ref[...] = (x_ref[...] * s_ref[...].astype(x_ref.dtype)).astype(o_ref.dtype)


def _choose_hw_tile(hw, c, itemsize, target_bytes=1 << 20):
    """Spatial tile: ~target_bytes per block, multiple of 8 sublanes, <= padded HW."""
    rows = max(8, (target_bytes // max(1, c * itemsize)) // 8 * 8)
    hw_ceil8 = -(-hw // 8) * 8
    return int(min(rows, hw_ceil8))


@jax.jit
def se_block(x, w1, b1, w2, b2):
    """x: (N, C, H, W); w1: (C//16, C), b1: (C//16,), w2: (C, C//16), b2: (C,)."""
    N, C, H, W = x.shape
    HW = H * W
    Cr = w1.shape[0]
    itemsize = jnp.dtype(x.dtype).itemsize

    # --- layout: channels-last so C sits on the lane axis ------------------------
    x_cl = jnp.transpose(x, (0, 2, 3, 1)).reshape(N, HW, C)

    hw_tile = _choose_hw_tile(HW, C, itemsize)
    num_tiles = -(-HW // hw_tile)
    hw_pad = num_tiles * hw_tile
    if hw_pad != HW:
        # Zero padding is harmless: zeros add nothing to the pooled sum and the padded
        # output rows are sliced off below.
        x_cl = jnp.pad(x_cl, ((0, 0), (0, hw_pad - HW), (0, 0)))

    block_bytes = hw_tile * C * itemsize
    # 2 double-buffered input blocks + 2 output blocks + gate/weights + headroom,
    # clamped to a range that is safe on v5e/v6e/v7x default scoped limits.
    vmem_limit = int(min(max(4 * block_bytes + (4 << 20), 16 << 20), 48 << 20))

    # Pre-transpose the FC weights once on the host/XLA side (reused by every step).
    w1_t = w1.T                      # (C, Cr)
    w2_t = w2.T                      # (Cr, C)
    b1_2d = b1.reshape(1, Cr)
    b2_2d = b2.reshape(1, C)

    # --- 1) squeeze: per-sample spatial sums --------------------------------------
    pooled_sum = pl.pallas_call(
        _pool_sum_kernel,
        out_shape=jax.ShapeDtypeStruct((N, 1, C), jnp.float32),
        grid_spec=pltpu.PrefetchScalarGridSpec(
            num_scalar_prefetch=0,
            grid=(N, num_tiles),
            in_specs=[pl.BlockSpec((1, hw_tile, C), lambda n, t: (n, t, 0))],
            out_specs=pl.BlockSpec((1, 1, C), lambda n, t: (n, 0, 0)),
        ),
        compiler_params=pltpu.CompilerParams(
            dimension_semantics=("parallel", "arbitrary"),
            vmem_limit_bytes=vmem_limit),
    )(x_cl)

    # --- 2) excitation: one batched FC1 -> ReLU -> FC2 -> sigmoid ------------------
    s_gate = pl.pallas_call(
        functools.partial(_excite_kernel, inv_hw=1.0 / HW),
        out_shape=jax.ShapeDtypeStruct((N, 1, C), jnp.float32),
        grid_spec=pltpu.PrefetchScalarGridSpec(
            num_scalar_prefetch=0,
            grid=(1,),
            in_specs=[
                pl.BlockSpec((N, 1, C), lambda i: (0, 0, 0)),
                pl.BlockSpec((C, Cr), lambda i: (0, 0)),
                pl.BlockSpec((1, Cr), lambda i: (0, 0)),
                pl.BlockSpec((Cr, C), lambda i: (0, 0)),
                pl.BlockSpec((1, C), lambda i: (0, 0)),
            ],
            out_specs=pl.BlockSpec((N, 1, C), lambda i: (0, 0, 0)),
        ),
        compiler_params=pltpu.CompilerParams(
            dimension_semantics=("arbitrary",)),
    )(pooled_sum, w1_t, b1_2d, w2_t, b2_2d)

    # --- 3) scale: stream x and apply the per-channel gate -------------------------
    out_cl = pl.pallas_call(
        _scale_kernel,
        out_shape=jax.ShapeDtypeStruct((N, hw_pad, C), x.dtype),
        grid_spec=pltpu.PrefetchScalarGridSpec(
            num_scalar_prefetch=0,
            grid=(N, num_tiles),
            in_specs=[
                pl.BlockSpec((1, hw_tile, C), lambda n, t: (n, t, 0)),
                pl.BlockSpec((1, 1, C), lambda n, t: (n, 0, 0)),
            ],
            out_specs=pl.BlockSpec((1, hw_tile, C), lambda n, t: (n, t, 0)),
        ),
        compiler_params=pltpu.CompilerParams(
            dimension_semantics=("parallel", "parallel"),
            vmem_limit_bytes=vmem_limit),
    )(x_cl, s_gate)

    out = out_cl[:, :HW, :].reshape(N, H, W, C)
    return jnp.transpose(out, (0, 3, 1, 2))


def _reference(x, w1, b1, w2, b2):
    """Pure-JAX reference mirroring the PyTorch forward."""
    pooled = jnp.mean(x, axis=(2, 3))                       # (N, C)
    h = jnp.maximum(pooled @ w1.T + b1, 0.0)                # (N, C//16)
    s = jax.nn.sigmoid(h @ w2.T + b2)                       # (N, C)
    return x * s[:, :, None, None]


if __name__ == "__main__":
    N, C, H, W = 2, 32, 16, 16          # in_channels=32 so C // 16 = 2
    key = jax.random.PRNGKey(0)
    kx, k1, k2, k3, k4 = jax.random.split(key, 5)

    x = jax.random.normal(kx, (N, C, H, W), dtype=jnp.float32)

    Cr = C // 16
    w1 = jax.random.normal(k1, (Cr, C), dtype=jnp.float32) * 0.1
    b1 = jax.random.normal(k2, (Cr,), dtype=jnp.float32) * 0.1
    w2 = jax.random.normal(k3, (C, Cr), dtype=jnp.float32) * 0.1
    b2 = jax.random.normal(k4, (C,), dtype=jnp.float32) * 0.1

    out = se_block(x, w1, b1, w2, b2)
    out = jax.block_until_ready(out)

    ref = _reference(x, w1, b1, w2, b2)
    assert out.shape == x.shape
    assert jnp.allclose(out, ref, atol=1e-5, rtol=1e-5), "mismatch vs reference"

    print("KERNEL_OK")
</pallas_src>

<mosaic_0001>
module attributes {stable_mosaic.version = 11 : i64} {
  func.func @_pool_sum_kernel(%arg0: i32, %arg1: i32, %arg2: memref<1x256x32xf32, #tpu.memory_space<vmem>>, %arg3: memref<1x1x32xf32, #tpu.memory_space<vmem>>) attributes {dimension_semantics = [#tpu.dimension_semantics<parallel>, #tpu.dimension_semantics<arbitrary>], iteration_bounds = array<i64: 2, 1>, scalar_prefetch = 0 : i64, scratch_operands = 0 : i64, tpu.core_type = #tpu.core_type<tc>, window_params = [{transform_indices = @transform_0, window_bounds = array<i64: 1, 256, 32>}, {transform_indices = @transform_1, window_bounds = array<i64: 1, 1, 32>}]} {
    %c0_i32 = arith.constant 0 : i32
    %0 = arith.cmpi eq, %arg1, %c0_i32 : i32
    %1 = arith.extui %0 : i1 to i32
    %c0_i32_0 = arith.constant 0 : i32
    %2 = arith.cmpi ne, %1, %c0_i32_0 : i32
    scf.if %2 {
      %cst_9 = arith.constant 0.000000e+00 : f32
      %9 = vector.broadcast %cst_9 : f32 to vector<1x1x32xf32>
      %c0_10 = arith.constant 0 : index
      %c0_11 = arith.constant 0 : index
      %c0_12 = arith.constant 0 : index
      %10 = vector.load %arg3[%c0_10, %c0_11, %c0_12] : memref<1x1x32xf32, #tpu.memory_space<vmem>>, vector<1x1x32xf32>
      tpu.vector_store %arg3[%c0_10, %c0_11, %c0_12], %9 {strides = array<i32>} : memref<1x1x32xf32, #tpu.memory_space<vmem>>, vector<1x1x32xf32>,
    } else {
    }
    %c0 = arith.constant 0 : index
    %c0_1 = arith.constant 0 : index
    %c0_2 = arith.constant 0 : index
    %3 = vector.load %arg3[%c0, %c0_1, %c0_2] : memref<1x1x32xf32, #tpu.memory_space<vmem>>, vector<1x1x32xf32>
    %c0_3 = arith.constant 0 : index
    %c0_4 = arith.constant 0 : index
    %c0_5 = arith.constant 0 : index
    %4 = vector.load %arg2[%c0_3, %c0_4, %c0_5] : memref<1x256x32xf32, #tpu.memory_space<vmem>>, vector<1x256x32xf32>
    %cst = arith.constant dense<0.000000e+00> : vector<1x32xf32>
    %5 = vector.multi_reduction <add>, %4, %cst [1] : vector<1x256x32xf32> to vector<1x32xf32>
    %6 = vector.shape_cast %5 : vector<1x32xf32> to vector<1x1x32xf32>
    %7 = arith.addf %3, %6 : vector<1x1x32xf32>
    %c0_6 = arith.constant 0 : index
    %c0_7 = arith.constant 0 : index
    %c0_8 = arith.constant 0 : index
    %8 = vector.load %arg3[%c0_6, %c0_7, %c0_8] : memref<1x1x32xf32, #tpu.memory_space<vmem>>, vector<1x1x32xf32>
    tpu.vector_store %arg3[%c0_6, %c0_7, %c0_8], %7 {strides = array<i32>} : memref<1x1x32xf32, #tpu.memory_space<vmem>>, vector<1x1x32xf32>,
    return
  }
  func.func @transform_0(%arg0: i32, %arg1: i32) -> (i32, i32, i32) {
    %c0_i32 = arith.constant 0 : i32
    %c0_i32_0 = arith.constant 0 : i32
    return %arg0, %arg1, %c0_i32 : i32, i32, i32
  }
  func.func @transform_1(%arg0: i32, %arg1: i32) -> (i32, i32, i32) {
    %c0_i32 = arith.constant 0 : i32
    %c0_i32_0 = arith.constant 0 : i32
    %c0_i32_1 = arith.constant 0 : i32
    return %arg0, %c0_i32, %c0_i32_0 : i32, i32, i32
  }
}

module attributes {stable_mosaic.version = 11 : i64} {
  func.func @_excite_kernel(%arg0: i32, %arg1: memref<2x1x32xf32, #tpu.memory_space<vmem>>, %arg2: memref<32x2xf32, #tpu.memory_space<vmem>>, %arg3: memref<1x2xf32, #tpu.memory_space<vmem>>, %arg4: memref<2x32xf32, #tpu.memory_space<vmem>>, %arg5: memref<1x32xf32, #tpu.memory_space<vmem>>, %arg6: memref<2x1x32xf32, #tpu.memory_space<vmem>>) attributes {dimension_semantics = [#tpu.dimension_semantics<arbitrary>], iteration_bounds = array<i64: 1>, scalar_prefetch = 0 : i64, scratch_operands = 0 : i64, tpu.core_type = #tpu.core_type<tc>, window_params = [{pipeline_mode = #tpu.pipeline_mode<synchronous>, transform_indices = @transform_0, window_bounds = array<i64: 2, 1, 32>}, {pipeline_mode = #tpu.pipeline_mode<synchronous>, transform_indices = @transform_1, window_bounds = array<i64: 32, 2>}, {pipeline_mode = #tpu.pipeline_mode<synchronous>, transform_indices = @transform_2, window_bounds = array<i64: 1, 2>}, {pipeline_mode = #tpu.pipeline_mode<synchronous>, transform_indices = @transform_3, window_bounds = array<i64: 2, 32>}, {pipeline_mode = #tpu.pipeline_mode<synchronous>, transform_indices = @transform_4, window_bounds = array<i64: 1, 32>}, {pipeline_mode = #tpu.pipeline_mode<synchronous>, transform_indices = @transform_5, window_bounds = array<i64: 2, 1, 32>}]} {
    %c0 = arith.constant 0 : index
    %c0_0 = arith.constant 0 : index
    %c0_1 = arith.constant 0 : index
    %0 = vector.load %arg1[%c0, %c0_0, %c0_1] : memref<2x1x32xf32, #tpu.memory_space<vmem>>, vector<2x1x32xf32>
    %1 = vector.shape_cast %0 : vector<2x1x32xf32> to vector<2x32xf32>
    %cst = arith.constant 3.906250e-03 : f32
    %2 = vector.broadcast %cst : f32 to vector<2x32xf32>
    %3 = arith.mulf %1, %2 : vector<2x32xf32>
    %c0_2 = arith.constant 0 : index
    %c0_3 = arith.constant 0 : index
    %4 = vector.load %arg2[%c0_2, %c0_3] : memref<32x2xf32, #tpu.memory_space<vmem>>, vector<32x2xf32>
    %cst_4 = arith.constant dense<0.000000e+00> : vector<2x2xf32>
    %5 = tpu.matmul %3, %4, %cst_4 {dimension_numbers = #tpu.dot_dimension_numbers<[1], [0], [0], [1], [0, 0, 1, 1], [], []>} : vector<2x32xf32>, vector<32x2xf32>, vector<2x2xf32> -> vector<2x2xf32>
    %c0_5 = arith.constant 0 : index
    %c0_6 = arith.constant 0 : index
    %6 = vector.load %arg3[%c0_5, %c0_6] : memref<1x2xf32, #tpu.memory_space<vmem>>, vector<1x2xf32>
    %7 = vector.broadcast %6 : vector<1x2xf32> to vector<2x2xf32>
    %8 = arith.addf %5, %7 : vector<2x2xf32>
    %cst_7 = arith.constant 0.000000e+00 : f32
    %9 = vector.broadcast %cst_7 : f32 to vector<2x2xf32>
    %10 = arith.maximumf %8, %9 : vector<2x2xf32>
    %c0_8 = arith.constant 0 : index
    %c0_9 = arith.constant 0 : index
    %11 = vector.load %arg4[%c0_8, %c0_9] : memref<2x32xf32, #tpu.memory_space<vmem>>, vector<2x32xf32>
    %cst_10 = arith.constant dense<0.000000e+00> : vector<2x32xf32>
    %12 = tpu.matmul %10, %11, %cst_10 {dimension_numbers = #tpu.dot_dimension_numbers<[1], [0], [0], [1], [0, 0, 1, 1], [], []>} : vector<2x2xf32>, vector<2x32xf32>, vector<2x32xf32> -> vector<2x32xf32>
    %c0_11 = arith.constant 0 : index
    %c0_12 = arith.constant 0 : index
    %13 = vector.load %arg5[%c0_11, %c0_12] : memref<1x32xf32, #tpu.memory_space<vmem>>, vector<1x32xf32>
    %14 = vector.broadcast %13 : vector<1x32xf32> to vector<2x32xf32>
    %15 = arith.addf %12, %14 : vector<2x32xf32>
    %cst_13 = arith.constant 0.000000e+00 : f32
    %16 = vector.broadcast %cst_13 : f32 to vector<2x32xf32>
    %17 = arith.subf %16, %15 : vector<2x32xf32>
    %18 = math.exp %17 : vector<2x32xf32>
    %cst_14 = arith.constant 1.000000e+00 : f32
    %19 = vector.broadcast %cst_14 : f32 to vector<2x32xf32>
    %20 = arith.addf %19, %18 : vector<2x32xf32>
    %cst_15 = arith.constant 1.000000e+00 : f32
    %21 = vector.broadcast %cst_15 : f32 to vector<2x32xf32>
    %22 = arith.divf %21, %20 : vector<2x32xf32>
    %23 = vector.shape_cast %22 : vector<2x32xf32> to vector<2x1x32xf32>
    %c0_16 = arith.constant 0 : index
    %c0_17 = arith.constant 0 : index
    %c0_18 = arith.constant 0 : index
    %24 = vector.load %arg6[%c0_16, %c0_17, %c0_18] : memref<2x1x32xf32, #tpu.memory_space<vmem>>, vector<2x1x32xf32>
    tpu.vector_store %arg6[%c0_16, %c0_17, %c0_18], %23 {strides = array<i32>} : memref<2x1x32xf32, #tpu.memory_space<vmem>>, vector<2x1x32xf32>,
    return
  }
  func.func @transform_0(%arg0: i32) -> (i32, i32, i32) {
    %c0_i32 = arith.constant 0 : i32
    %c0_i32_0 = arith.constant 0 : i32
    %c0_i32_1 = arith.constant 0 : i32
    %c0_i32_2 = arith.constant 0 : i32
    return %c0_i32, %c0_i32_0, %c0_i32_1 : i32, i32, i32
  }
  func.func @transform_1(%arg0: i32) -> (i32, i32) {
    %c0_i32 = arith.constant 0 : i32
    %c0_i32_0 = arith.constant 0 : i32
    %c0_i32_1 = arith.constant 0 : i32
    return %c0_i32, %c0_i32_0 : i32, i32
  }
  func.func @transform_2(%arg0: i32) -> (i32, i32) {
    %c0_i32 = arith.constant 0 : i32
    %c0_i32_0 = arith.constant 0 : i32
    %c0_i32_1 = arith.constant 0 : i32
    return %c0_i32, %c0_i32_0 : i32, i32
  }
  func.func @transform_3(%arg0: i32) -> (i32, i32) {
    %c0_i32 = arith.constant 0 : i32
    %c0_i32_0 = arith.constant 0 : i32
    %c0_i32_1 = arith.constant 0 : i32
    return %c0_i32, %c0_i32_0 : i32, i32
  }
  func.func @transform_4(%arg0: i32) -> (i32, i32) {
    %c0_i32 = arith.constant 0 : i32
    %c0_i32_0 = arith.constant 0 : i32
    %c0_i32_1 = arith.constant 0 : i32
    return %c0_i32, %c0_i32_0 : i32, i32
  }
  func.func @transform_5(%arg0: i32) -> (i32, i32, i32) {
    %c0_i32 = arith.constant 0 : i32
    %c0_i32_0 = arith.constant 0 : i32
    %c0_i32_1 = arith.constant 0 : i32
    %c0_i32_2 = arith.constant 0 : i32
    return %c0_i32, %c0_i32_0, %c0_i32_1 : i32, i32, i32
  }
}

module attributes {stable_mosaic.version = 11 : i64} {
  func.func @_scale_kernel(%arg0: i32, %arg1: i32, %arg2: memref<1x256x32xf32, #tpu.memory_space<vmem>>, %arg3: memref<1x1x32xf32, #tpu.memory_space<vmem>>, %arg4: memref<1x256x32xf32, #tpu.memory_space<vmem>>) attributes {dimension_semantics = [#tpu.dimension_semantics<parallel>, #tpu.dimension_semantics<parallel>], iteration_bounds = array<i64: 2, 1>, scalar_prefetch = 0 : i64, scratch_operands = 0 : i64, tpu.core_type = #tpu.core_type<tc>, window_params = [{transform_indices = @transform_0, window_bounds = array<i64: 1, 256, 32>}, {transform_indices = @transform_1, window_bounds = array<i64: 1, 1, 32>}, {transform_indices = @transform_2, window_bounds = array<i64: 1, 256, 32>}]} {
    %c0 = arith.constant 0 : index
    %c0_0 = arith.constant 0 : index
    %c0_1 = arith.constant 0 : index
    %0 = vector.load %arg2[%c0, %c0_0, %c0_1] : memref<1x256x32xf32, #tpu.memory_space<vmem>>, vector<1x256x32xf32>
    %c0_2 = arith.constant 0 : index
    %c0_3 = arith.constant 0 : index
    %c0_4 = arith.constant 0 : index
    %1 = vector.load %arg3[%c0_2, %c0_3, %c0_4] : memref<1x1x32xf32, #tpu.memory_space<vmem>>, vector<1x1x32xf32>
    %2 = vector.broadcast %1 : vector<1x1x32xf32> to vector<1x256x32xf32>
    %3 = arith.mulf %0, %2 : vector<1x256x32xf32>
    %c0_5 = arith.constant 0 : index
    %c0_6 = arith.constant 0 : index
    %c0_7 = arith.constant 0 : index
    %4 = vector.load %arg4[%c0_5, %c0_6, %c0_7] : memref<1x256x32xf32, #tpu.memory_space<vmem>>, vector<1x256x32xf32>
    tpu.vector_store %arg4[%c0_5, %c0_6, %c0_7], %3 {strides = array<i32>} : memref<1x256x32xf32, #tpu.memory_space<vmem>>, vector<1x256x32xf32>,
    return
  }
  func.func @transform_0(%arg0: i32, %arg1: i32) -> (i32, i32, i32) {
    %c0_i32 = arith.constant 0 : i32
    %c0_i32_0 = arith.constant 0 : i32
    return %arg0, %arg1, %c0_i32 : i32, i32, i32
  }
  func.func @transform_1(%arg0: i32, %arg1: i32) -> (i32, i32, i32) {
    %c0_i32 = arith.constant 0 : i32
    %c0_i32_0 = arith.constant 0 : i32
    %c0_i32_1 = arith.constant 0 : i32
    return %arg0, %c0_i32, %c0_i32_0 : i32, i32, i32
  }
  func.func @transform_2(%arg0: i32, %arg1: i32) -> (i32, i32, i32) {
    %c0_i32 = arith.constant 0 : i32
    %c0_i32_0 = arith.constant 0 : i32
    return %arg0, %arg1, %c0_i32 : i32, i32, i32
  }
}

</mosaic_0001>

<bundles_post_ra>
// kernel: se_block.3
= control target key start
LH: loop header
LB: loop body
LE: loop exit
PB: predicated region body
PF: predicated region fallthrough
CT: control target
= control target key end

     0   :  { %6 = vsyncpa [#allocation3], 0  ;;  %s695_s0 = inlined_call_operand.hbm [shape: f32[2,256,32], index: 0, kind: input, shape index: {}]   ;;  %s696_s1 = inlined_call_operand.vmem [shape: f32[2,1,32], index: 1, kind: output, shape index: {}]  }
   0x1   :  { %8 = vsyncpa [#allocation3 + $0x1], 0  ;;  %s498_s6 = smov 0   ;;  %s500_s7 = smov 0  }
   0x2   :  { %s502_s8 = smov 0   ;;  %s504_s9 = smov 0  }
   0x3   :  { %s506_s10 = smov 0   ;;  %s508_s11 = smov 0  }
   0x4 LB: > { %s332_s12 = sadd.s32 4294967295, %s482_s11   ;;  %s26_s13 = sadd.s32 1, %s478_s10  ;;  %s482_s11 = sphi %s508_s11, %s14_s11   ;;  %s478_s10 = sphi %s506_s10, %s704_s10   ;;  %s474_s9 = sphi %s504_s9, %s703_s9   ;;  %s470_s8 = sphi %s502_s8, %s702_s8   ;;  %s466_s7 = sphi %s500_s7, %s701_s7   ;;  %s462_s6 = sphi %s498_s6, %s700_s6  }
   0x5   : > { %p28_p0 = scmp.ge.s32.totalorder %s26_s13, 2  ;;  %s35_s14 = sadd.s32 1, %s470_s8 }
   0x6   : > { %p42_p1 = scmp.ne.s32.totalorder %s470_s8, %s466_s7  ;;  %p43_p2 = scmp.eq.s32.totalorder %s482_s11, 0 }
   0x7   : > { %s706_s13 = smov (%p28_p0, %s26_s13), 0  ;;  %p48_p4 = scmp.ne.s32.totalorder %s466_s7, %s462_s6 }
   0x8   : > { %p534_p3 = por %p43_p2, %p42_p1  ;;  %s30_s16 = ssub.s32 %s478_s10, %s706_s13 }
   0x9   : > { %p49_p5 = scmp.eq.s32.totalorder %s332_s12, 0  ;;  %p33_p6 = scmp.eq.s32.totalorder %s30_s16, 0 }
   0xa   : > { %p350_p8 = scmp.lt.s32.totalorder %s482_s11, 2  ;;  %s98_s19 = sand.u32 1, %s470_s8  }
   0xb   : > { %p541_p7 = por %p49_p5, %p48_p4  ;;  %s343_s20 = sshll.u32 %s478_s10, 12 }
   0xc   : > { %s547_s18 = scalar_select %p33_p6, %s470_s8, %s35_s14  }
   0xd   : > { %s336_s21 = sshll.u32 %s98_s19, 8  ;;  %s554_s24 = scalar_lea.hbm %s695_s0, %s343_s20 }
   0xe   : > { %s102_s25 = scalar_lea.vmem [#allocation2], %s336_s21  ;;  %p558_p9 = pnand %p350_p8, %p534_p3 }
   0xf   : > { %s111_s26 = sshll.u32 %s102_s25, 4  ;;  %s564_s28 = scalar_lea.sflag [#allocation3], %s98_s19  ;;  %s562_s26 = int_to_ptr.vmem [resolvable:$true] %s111_s26 }
  0x10   : > { %s402_s29 = scalar_lea.hbm %s554_s24, 4096  ;;  %p404_p11 = pneg %p558_p9 }
  0x11   : > { %p403_p10 = scmp.ne.s32.totalorder %s554_s24, %s402_s29  ;;  %s407_s3 = scalar_lea.hbm %s695_s0, 8192 }
  0x12   : > { %p408_p0 = scmp.lt.u32.totalorder %s554_s24, %s695_s0  ;;  %p409_p1 = scmp.lt.u32.totalorder %s407_s3, %s402_s29 }
  0x13   : > { %p405_p12 = pnand %p404_p11, %p403_p10  ;;  %p411_p3 = scmp.lt.u32.totalorder %s402_s29, %s554_s24 }
  0x14   : > { %p410_p2 = por %p409_p1, %p408_p0 }
  0x15   : > { %p406_p13 = pneg %p405_p12 }
  0x16   : > { %p412_p4 = por %p411_p3, %p410_p2 }
  0x18   : > { %p413_p5 = pnand %p412_p4, %p406_p13 }
  0x1a   : > { %416 = shalt.err (!%p413_p5)
}
  0x1b   : > { %s417_s6 = scalar_lea.vmem %s562_s26, 4096  ;;  %s484_s12 = smov [#allocation2]  }
  0x1c   : > { %p418_p6 = scmp.ne.s32.totalorder %s562_s26, %s417_s6  ;;  %s422_s14 = sshll.u32 %s484_s12, 4  ;;  %s423_s14 = int_to_ptr.vmem [resolvable:$false] %s422_s14 }
  0x1d   : > { %s424_s15 = scalar_lea.vmem %s423_s14, 8192  ;;  %p425_p12 = scmp.lt.s32.totalorder %s562_s26, %s423_s14 }
  0x1e   : > { %p420_p8 = pnand %p418_p6, %p404_p11  ;;  %p426_p0 = scmp.lt.s32.totalorder %s424_s15, %s417_s6 }
  0x20   : > { %p421_p10 = pneg %p420_p8  ;;  %p427_p1 = por %p426_p0, %p425_p12 }
  0x22   : > { %p428_p2 = pnand %p427_p1, %p421_p10 }
  0x24   : > { %431 = shalt.err (!%p428_p2)
}
  0x25   : > { %s485_s16 = smov 128   ;;  %s486_s19 = smov 8  }
  0x26   : > { %349 = dma.hbm_to_vmem [thread:$0]  (!%p558_p9), %s554_s24, 4096, %s562_s26, %s564_s28, %s485_s16, %s485_s16, %s486_s19  }
  0x27   : > { %p339_p11 = scmp.ge.s32.totalorder %s482_s11, 1  ;;  %p119_p13 = scmp.lt.s32.totalorder %s482_s11, 3 }
  0x29   : > { %p120_p3 = pnand %p339_p11, %p119_p13 }
  0x2a   : > { %s125_s20 = sand.u32 (!%p120_p3), 1, %s466_s7  }
  0x2b   : > { %123 = sbr.rel (%p120_p3) target bundleno = 131 (0x83), region = 24  ;;  %s340_s21 = sshll.u32 (!%p120_p3), %s125_s20, 8 }
  0x2c   : > { %s126_s22 = scalar_lea.sflag (!%p120_p3), [#allocation3], %s125_s20  ;;  %s595_s23 = scalar_lea.vmem (!%p120_p3), [#allocation2], %s340_s21 }
  0x32   : > { %457 = dma.done.wait (%p541_p7), %s126_s22, 4096  }
  0x33   : > { %459 = vsyncadd (%p541_p7), %s126_s22, 4294963200  ;;  %p147_p9 = scmp.lt.s32.totalorder %s474_s9, 1  ;;  %vm154_vm0 = vcmask 253952   ;;  %v487_v0 = vmov 0.0   ;;  %vm189_vm1 = vcmask 261120   ;;  %v157_v1 = vld [vmem:[%s595_s23] sm:$0xff] }
  0x34   : > { %v158_v2 = vld [vmem:[%s595_s23 + $0x8] sm:$0xff]  ;;  %v159_v3 = vld [vmem:[%s595_s23 + $0x10] sm:$0xff]  ;;  %v160_v4 = vld [vmem:[%s595_s23 + $0x18] sm:$0xff]  ;;  %v190_v5 = vsel %vm189_vm1, %v157_v1, 0.0 }
  0x35   : > { %s708_s9 = smov (!%p147_p9, %s474_s9), 1  ;;  %v191_v6 = vsel %vm189_vm1, %v158_v2, 0.0  ;;  %v193_v7 = vsel %vm189_vm1, %v159_v3, 0.0  ;;  %v161_v8 = vld [vmem:[%s595_s23 + $0x20] sm:$0xff]  ;;  %v195_v10 = vsel %vm189_vm1, %v160_v4, 0.0  ;;  %v162_v11 = vld [vmem:[%s595_s23 + $0x28] sm:$0xff] }
  0x36   : > { %s606_s26 = scalar_lea.vmem %s696_s1, %s708_s9  ;;  %v192_v9 = vadd.f32 %v191_v6, %v190_v5  ;;  %v197_v13 = vsel %vm189_vm1, %v161_v8, 0.0  ;;  %v163_v14 = vld [vmem:[%s595_s23 + $0x30] sm:$0xff]  ;;  %v199_v16 = vsel %vm189_vm1, %v162_v11, 0.0  ;;  %v164_v17 = vld [vmem:[%s595_s23 + $0x38] sm:$0xff]  ;;  %v165_v20 = vld [vmem:[%s595_s23 + $0x40] sm:$0xff] }
  0x37   : > { %155 = vst.msk [vmem:[%s606_s26] sm:$0x1] %vm154_vm0, %v487_v0  ;;  %v201_v19 = vsel %vm189_vm1, %v163_v14, 0.0  ;;  %v203_v22 = vsel %vm189_vm1, %v164_v17, 0.0  ;;  %v166_v23 = vld [vmem:[%s595_s23 + $0x48] sm:$0xff]  ;;  %v205_v25 = vsel %vm189_vm1, %v165_v20, 0.0 }
  0x38   : > { %v194_v12 = vadd.f32 %v193_v7, %v192_v9  ;;  %v167_v26 = vld [vmem:[%s595_s23 + $0x50] sm:$0xff]  ;;  %v207_v28 = vsel %vm189_vm1, %v166_v23, 0.0  ;;  %v168_v29 = vld [vmem:[%s595_s23 + $0x58] sm:$0xff]  ;;  %v169_v32 = vld [vmem:[%s595_s23 + $0x60] sm:$0xff] }
  0x39   : > { %v209_v31 = vsel %vm189_vm1, %v167_v26, 0.0  ;;  %v211_v34 = vsel %vm189_vm1, %v168_v29, 0.0  ;;  %v170_v35 = vld [vmem:[%s595_s23 + $0x68] sm:$0xff]  ;;  %v213_v37 = vsel %vm189_vm1, %v169_v32, 0.0  ;;  %v171_v38 = vld [vmem:[%s595_s23 + $0x70] sm:$0xff]  ;;  %v172_v41 = vld [vmem:[%s595_s23 + $0x78] sm:$0xff] }
  0x3a   : > { %v196_v15 = vadd.f32 %v195_v10, %v194_v12  ;;  %v215_v40 = vsel %vm189_vm1, %v170_v35, 0.0  ;;  %v217_v43 = vsel %vm189_vm1, %v171_v38, 0.0  ;;  %v173_v44 = vld [vmem:[%s595_s23 + $0x80] sm:$0xff]  ;;  %v219_v46 = vsel %vm189_vm1, %v172_v41, 0.0  ;;  %v174_v47 = vld [vmem:[%s595_s23 + $0x88] sm:$0xff]  ;;  %v175_v50 = vld [vmem:[%s595_s23 + $0x90] sm:$0xff] }
  0x3b   : > { %v221_v49 = vsel %vm189_vm1, %v173_v44, 0.0  ;;  %v223_v52 = vsel %vm189_vm1, %v174_v47, 0.0  ;;  %v176_v53 = vld [vmem:[%s595_s23 + $0x98] sm:$0xff]  ;;  %v225_v55 = vsel %vm189_vm1, %v175_v50, 0.0  ;;  %v177_v56 = vld [vmem:[%s595_s23 + $0xa0] sm:$0xff]  ;;  %v178_v59 = vld [vmem:[%s595_s23 + $0xa8] sm:$0xff] }
  0x3c   : > { %v198_v18 = vadd.f32 %v197_v13, %v196_v15  ;;  %v227_v58 = vsel %vm189_vm1, %v176_v53, 0.0  ;;  %v229_v61 = vsel %vm189_vm1, %v177_v56, 0.0  ;;  %v179_v62 = vld [vmem:[%s595_s23 + $0xb0] sm:$0xff]  ;;  %v231_v0 = vsel %vm189_vm1, %v178_v59, 0.0  ;;  %v180_v1 = vld [vmem:[%s595_s23 + $0xb8] sm:$0xff]  ;;  %v181_v4 = vld [vmem:[%s595_s23 + $0xc0] sm:$0xff] }
  0x3d   : > { %v233_v3 = vsel %vm189_vm1, %v179_v62, 0.0  ;;  %v235_v6 = vsel %vm189_vm1, %v180_v1, 0.0  ;;  %v182_v7 = vld [vmem:[%s595_s23 + $0xc8] sm:$0xff]  ;;  %v237_v9 = vsel %vm189_vm1, %v181_v4, 0.0  ;;  %v183_v10 = vld [vmem:[%s595_s23 + $0xd0] sm:$0xff]  ;;  %v184_v13 = vld [vmem:[%s595_s23 + $0xd8] sm:$0xff] }
  0x3e   : > { %v200_v21 = vadd.f32 %v199_v16, %v198_v18  ;;  %v239_v12 = vsel %vm189_vm1, %v182_v7, 0.0  ;;  %v241_v15 = vsel %vm189_vm1, %v183_v10, 0.0  ;;  %v185_v16 = vld [vmem:[%s595_s23 + $0xe0] sm:$0xff]  ;;  %v243_v18 = vsel %vm189_vm1, %v184_v13, 0.0 }
  0x40   : > { %v202_v24 = vadd.f32 %v201_v19, %v200_v21  ;;  %v186_v19 = vld [vmem:[%s595_s23 + $0xe8] sm:$0xff]  ;;  %v245_v21 = vsel %vm189_vm1, %v185_v16, 0.0 }
  0x42   : > { %v204_v27 = vadd.f32 %v203_v22, %v202_v24  ;;  %v187_v22 = vld [vmem:[%s595_s23 + $0xf0] sm:$0xff]  ;;  %v247_v24 = vsel %vm189_vm1, %v186_v19, 0.0 }
  0x44   : > { %v206_v30 = vadd.f32 %v205_v25, %v204_v27  ;;  %v188_v25 = vld [vmem:[%s595_s23 + $0xf8] sm:$0xff]  ;;  %v249_v27 = vsel %vm189_vm1, %v187_v22, 0.0 }
  0x45   : > { %v251_v29 = vsel %vm189_vm1, %v188_v25, 0.0 }
  0x46   : > { %v208_v33 = vadd.f32 %v207_v28, %v206_v30 }
  0x48   : > { %v210_v36 = vadd.f32 %v209_v31, %v208_v33 }
  0x4a   : > { %v212_v39 = vadd.f32 %v211_v34, %v210_v36 }
  0x4c   : > { %v214_v42 = vadd.f32 %v213_v37, %v212_v39  ;;  %v156_v37 = vld [vmem:[%s606_s26] sm:$0x1] }
  0x4e   : > { %v216_v45 = vadd.f32 %v215_v40, %v214_v42 }
  0x50   : > { %v218_v48 = vadd.f32 %v217_v43, %v216_v45 }
  0x52   : > { %v220_v51 = vadd.f32 %v219_v46, %v218_v48 }
  0x54   : > { %v222_v54 = vadd.f32 %v221_v49, %v220_v51 }
  0x56   : > { %v224_v57 = vadd.f32 %v223_v52, %v222_v54 }
  0x58   : > { %v226_v60 = vadd.f32 %v225_v55, %v224_v57 }
  0x5a   : > { %v228_v63 = vadd.f32 %v227_v58, %v226_v60 }
  0x5c   : > { %v230_v2 = vadd.f32 %v229_v61, %v228_v63 }
  0x5e   : > { %v232_v5 = vadd.f32 %v231_v0, %v230_v2 }
  0x60   : > { %v234_v8 = vadd.f32 %v233_v3, %v232_v5 }
  0x62   : > { %v236_v11 = vadd.f32 %v235_v6, %v234_v8 }
  0x64   : > { %v238_v14 = vadd.f32 %v237_v9, %v236_v11 }
  0x66   : > { %v240_v17 = vadd.f32 %v239_v12, %v238_v14 }
  0x68   : > { %v242_v20 = vadd.f32 %v241_v15, %v240_v17 }
  0x6a   : > { %v244_v23 = vadd.f32 %v243_v18, %v242_v20 }
  0x6c   : > { %v246_v26 = vadd.f32 %v245_v21, %v244_v23 }
  0x6e   : > { %v248_v28 = vadd.f32 %v247_v24, %v246_v26 }
  0x70   : > { %v250_v30 = vadd.f32 %v249_v27, %v248_v28 }
  0x72   : > { %v252_v31 = vadd.f32 %v251_v29, %v250_v30 }
  0x74   : > { %v253_v32 = vrot.slane %v252_v31, 4 }
  0x76   : > { %v254_v33 = vadd.f32 %v253_v32, %v252_v31 }
  0x78   : > { %v255_v34 = vrot.slane %v254_v33, 2 }
  0x7a   : > { %v256_v35 = vadd.f32 %v255_v34, %v254_v33 }
  0x7c   : > { %v257_v36 = vrot.slane %v256_v35, 1 }
  0x7e   : > { %v258_v38 = vadd.f32 %v257_v36, %v256_v35 }
  0x80   : > { %v259_v39 = vadd.f32 %v258_v38, %v156_v37 }
  0x82   : > { %261 = vst.msk [vmem:[%s606_s26] sm:$0x1] %vm154_vm0, %v259_v39 }
  0x83 PF: > { %s14_s11 = sadd.s32 1, %s482_s11   ;;  %s700_s6 = smov %s466_s7 }
  0x84   : > { %p11_p7 = scmp.ge.s32.totalorder %s14_s11, 4   ;;  %s701_s7 = smov %s470_s8 }
  0x85   : > { %s702_s8 = smov %s547_s18  ;;  %s703_s9 = smov %s478_s10 }
  0x86   : > { %s704_s10 = smov %s706_s13  ;;  %13 = sbr.rel (!%p11_p7) target bundleno = 4 (0x4), region = 68 }
  0x8d   :  { %279 = vsyncpa [#allocation3], 1 }
  0x8e   :  { %281 = vsyncpa [#allocation3 + $0x1], 1 }

// kernel: se_block.5
= control target key start
LH: loop header
LB: loop body
LE: loop exit
PB: predicated region body
PF: predicated region fallthrough
CT: control target
= control target key end

     0   :  { %7 = vsyncpa [#allocation3], 0  ;;  %s823_s0 = inlined_call_operand.vmem [shape: f32[2,256,32], index: 0, kind: input, shape index: {}]   ;;  %s824_s1 = inlined_call_operand.vmem [shape: f32[2,1,32], index: 1, kind: input, shape index: {}]   ;;  %s825_s2 = inlined_call_operand.hbm [shape: f32[2,256,32], index: 2, kind: output, shape index: {}]  }
   0x1   :  { %9 = vsyncpa [#allocation3 + $0x1], 0  ;;  %s566_s9 = smov 0   ;;  %s568_s10 = smov 0  }
   0x2   :  { %s570_s11 = smov 0   ;;  %s572_s12 = smov 0  }
   0x3   :  { %s574_s13 = smov 0   ;;  %s576_s14 = smov 0  }
   0x4 LB: > { %s395_s15 = sadd.s32 4294967295, %s546_s14   ;;  %s396_s16 = sadd.s32 4294967294, %s546_s14   ;;  %s546_s14 = sphi %s576_s14, %s15_s14   ;;  %s542_s13 = sphi %s574_s13, %s832_s13   ;;  %s538_s12 = sphi %s572_s12, %s831_s12   ;;  %s534_s11 = sphi %s570_s11, %s830_s11   ;;  %s530_s10 = sphi %s568_s10, %s829_s10   ;;  %s526_s9 = sphi %s566_s9, %s828_s9  }
   0x5   : > { %s27_s17 = sadd.s32 1, %s542_s13  ;;  %s90_s18 = sadd.s32 1, %s534_s11 }
   0x6   : > { %p29_p0 = scmp.ge.s32.totalorder %s27_s17, 2  ;;  %p100_p1 = scmp.ne.s32.totalorder %s534_s11, %s530_s10 }
   0x7   : > { %p101_p2 = scmp.eq.s32.totalorder %s395_s15, 1  ;;  %p106_p3 = scmp.ne.s32.totalorder %s530_s10, %s526_s9 }
   0x8   : > { %s834_s17 = smov (%p29_p0, %s27_s17), 0  ;;  %p107_p5 = scmp.eq.s32.totalorder %s396_s16, 1 }
   0x9   : > { %p606_p4 = por %p101_p2, %p100_p1  ;;  %s85_s20 = ssub.s32 %s542_s13, %s834_s17 }
   0xa   : > { %p399_p6 = scmp.ge.s32.totalorder %s546_s14, 1  ;;  %p88_p7 = scmp.eq.s32.totalorder %s85_s20, 0 }
   0xb   : > { %p613_p8 = por %p107_p5, %p106_p3  ;;  %p144_p9 = scmp.lt.s32.totalorder %s546_s14, 3 }
   0xc   : > { %s619_s22 = scalar_select %p88_p7, %s534_s11, %s90_s18  }
   0xd   : > { %p145_p10 = pnand %p399_p6, %p144_p9 }
   0xe   : > { %p174_p11 = scmp.lt.s32.totalorder (!%p145_p10), %s538_s12, 1  ;;  %s170_s23 = sand.u32 (!%p145_p10), 1, %s530_s10   ;;  %vm258_vm0 = vcmask (!%p145_p10), 261120  }
   0xf   : > { %148 = sbr.rel (%p145_p10) target bundleno = 59 (0x3b), region = 28  ;;  %s400_s25 = sshll.u32 (!%p145_p10), %s170_s23, 8 }
  0x10   : > { %s651_s5 = scalar_lea.vmem (!%p145_p10), [#allocation2], %s400_s25  ;;  %s410_s6 = sshll.u32 (!%p145_p10), %s538_s12, 12 }
  0x11   : > { %s307_s7 = sshll.u32 (!%p145_p10), %s651_s5, 4  ;;  %s753_s15 = scalar_lea.hbm (!%p145_p10), %s825_s2, %s410_s6  ;;  %s755_s7 = int_to_ptr.vmem [resolvable:$true] %s307_s7 }
  0x12   : > { %s777_s16 = scalar_lea.sflag (!%p145_p10), [#allocation3], %s170_s23  ;;  %s468_s18 = scalar_lea.vmem (!%p145_p10), %s755_s7, 4096 }
  0x13   : > { %p469_p12 = scmp.ne.s32.totalorder (!%p145_p10), %s755_s7, %s468_s18  ;;  %s548_s20 = smov (!%p145_p10), [#allocation2]  }
  0x15   : > { %p470_p13 = pnand (!%p145_p10), %p469_p12, %p606_p4 }
  0x16   : > { %s175_s24 = scalar_select %p174_p11, %s538_s12, 1 }
  0x17   : > { %p471_p0 = pneg %p470_p13 }
  0x18   : > { %s409_s26 = sshll.u32 %s175_s24, 8  ;;  %s185_s29 = scalar_lea.vmem %s824_s1, %s175_s24 }
  0x19   : > { %s632_s4 = scalar_lea.vmem %s823_s0, %s409_s26  ;;  %v634_v0 = vld [vmem:[%s185_s29] ss:$0 sm:$0xff]  ;;  %s472_s24 = sshll.u32 %s548_s20, 4  ;;  %s473_s24 = int_to_ptr.vmem [resolvable:$false] %s472_s24 }
  0x1a   : > { %v187_v1 = vld [vmem:[%s632_s4] sm:$0xff]  ;;  %v188_v2 = vld [vmem:[%s632_s4 + $0x8] sm:$0xff]  ;;  %v189_v3 = vld [vmem:[%s632_s4 + $0x10] sm:$0xff]  ;;  %s474_s25 = scalar_lea.vmem %s473_s24, 8192  ;;  %p475_p1 = scmp.lt.s32.totalorder %s755_s7, %s473_s24 }
  0x1b   : > { %v226_v4 = vmul.f32 %v634_v0, %v187_v1  ;;  %v227_v5 = vmul.f32 %v634_v0, %v188_v2  ;;  %v228_v6 = vmul.f32 %v634_v0, %v189_v3  ;;  %v190_v7 = vld [vmem:[%s632_s4 + $0x18] sm:$0xff]  ;;  %v191_v8 = vld [vmem:[%s632_s4 + $0x20] sm:$0xff]  ;;  %v192_v9 = vld [vmem:[%s632_s4 + $0x28] sm:$0xff]  ;;  %p476_p2 = scmp.lt.s32.totalorder %s474_s25, %s468_s18 }
  0x1c   : > { %v229_v10 = vmul.f32 %v634_v0, %v190_v7  ;;  %v230_v11 = vmul.f32 %v634_v0, %v191_v8  ;;  %v231_v12 = vmul.f32 %v634_v0, %v192_v9  ;;  %v193_v13 = vld [vmem:[%s632_s4 + $0x30] sm:$0xff]  ;;  %v194_v14 = vld [vmem:[%s632_s4 + $0x38] sm:$0xff]  ;;  %v195_v15 = vld [vmem:[%s632_s4 + $0x40] sm:$0xff] }
  0x1d   : > { %259 = vst.msk [vmem:[%s651_s5] sm:$0xff] %vm258_vm0, %v226_v4  ;;  %260 = vst.msk [vmem:[%s651_s5 + $0x8] sm:$0xff] %vm258_vm0, %v227_v5  ;;  %v232_v16 = vmul.f32 %v634_v0, %v193_v13  ;;  %v233_v17 = vmul.f32 %v634_v0, %v194_v14  ;;  %v234_v18 = vmul.f32 %v634_v0, %v195_v15  ;;  %v196_v19 = vld [vmem:[%s632_s4 + $0x48] sm:$0xff]  ;;  %v197_v20 = vld [vmem:[%s632_s4 + $0x50] sm:$0xff]  ;;  %p477_p3 = por %p476_p2, %p475_p1 }
  0x1e   : > { %261 = vst.msk [vmem:[%s651_s5 + $0x10] sm:$0xff] %vm258_vm0, %v228_v6  ;;  %v198_v21 = vld [vmem:[%s632_s4 + $0x58] sm:$0xff]  ;;  %262 = vst.msk [vmem:[%s651_s5 + $0x18] sm:$0xff] %vm258_vm0, %v229_v10  ;;  %v235_v22 = vmul.f32 %v634_v0, %v196_v19  ;;  %v236_v23 = vmul.f32 %v634_v0, %v197_v20  ;;  %v199_v25 = vld [vmem:[%s632_s4 + $0x60] sm:$0xff] }
  0x1f   : > { %263 = vst.msk [vmem:[%s651_s5 + $0x20] sm:$0xff] %vm258_vm0, %v230_v11  ;;  %264 = vst.msk [vmem:[%s651_s5 + $0x28] sm:$0xff] %vm258_vm0, %v231_v12  ;;  %v237_v24 = vmul.f32 %v634_v0, %v198_v21  ;;  %v200_v26 = vld [vmem:[%s632_s4 + $0x68] sm:$0xff]  ;;  %v201_v27 = vld [vmem:[%s632_s4 + $0x70] sm:$0xff]  ;;  %v238_v28 = vmul.f32 %v634_v0, %v199_v25  ;;  %p478_p5 = pnand %p477_p3, %p471_p0 }
  0x20   : > { %265 = vst.msk [vmem:[%s651_s5 + $0x30] sm:$0xff] %vm258_vm0, %v232_v16  ;;  %266 = vst.msk [vmem:[%s651_s5 + $0x38] sm:$0xff] %vm258_vm0, %v233_v17  ;;  %v239_v29 = vmul.f32 %v634_v0, %v200_v26  ;;  %v240_v30 = vmul.f32 %v634_v0, %v201_v27  ;;  %v202_v31 = vld [vmem:[%s632_s4 + $0x78] sm:$0xff]  ;;  %v203_v32 = vld [vmem:[%s632_s4 + $0x80] sm:$0xff] }
  0x21   : > { %267 = vst.msk [vmem:[%s651_s5 + $0x40] sm:$0xff] %vm258_vm0, %v234_v18  ;;  %v204_v33 = vld [vmem:[%s632_s4 + $0x88] sm:$0xff]  ;;  %268 = vst.msk [vmem:[%s651_s5 + $0x48] sm:$0xff] %vm258_vm0, %v235_v22  ;;  %v241_v34 = vmul.f32 %v634_v0, %v202_v31  ;;  %v242_v35 = vmul.f32 %v634_v0, %v203_v32  ;;  %v205_v37 = vld [vmem:[%s632_s4 + $0x90] sm:$0xff] }
  0x22   : > { %269 = vst.msk [vmem:[%s651_s5 + $0x50] sm:$0xff] %vm258_vm0, %v236_v23  ;;  %270 = vst.msk [vmem:[%s651_s5 + $0x58] sm:$0xff] %vm258_vm0, %v237_v24  ;;  %v243_v36 = vmul.f32 %v634_v0, %v204_v33  ;;  %v206_v38 = vld [vmem:[%s632_s4 + $0x98] sm:$0xff]  ;;  %v207_v39 = vld [vmem:[%s632_s4 + $0xa0] sm:$0xff]  ;;  %v244_v40 = vmul.f32 %v634_v0, %v205_v37 }
  0x23   : > { %271 = vst.msk [vmem:[%s651_s5 + $0x60] sm:$0xff] %vm258_vm0, %v238_v28  ;;  %272 = vst.msk [vmem:[%s651_s5 + $0x68] sm:$0xff] %vm258_vm0, %v239_v29  ;;  %v245_v41 = vmul.f32 %v634_v0, %v206_v38  ;;  %v246_v42 = vmul.f32 %v634_v0, %v207_v39  ;;  %v208_v43 = vld [vmem:[%s632_s4 + $0xa8] sm:$0xff]  ;;  %v209_v44 = vld [vmem:[%s632_s4 + $0xb0] sm:$0xff] }
  0x24   : > { %273 = vst.msk [vmem:[%s651_s5 + $0x70] sm:$0xff] %vm258_vm0, %v240_v30  ;;  %v210_v45 = vld [vmem:[%s632_s4 + $0xb8] sm:$0xff]  ;;  %274 = vst.msk [vmem:[%s651_s5 + $0x78] sm:$0xff] %vm258_vm0, %v241_v34  ;;  %v247_v46 = vmul.f32 %v634_v0, %v208_v43  ;;  %v248_v47 = vmul.f32 %v634_v0, %v209_v44  ;;  %v211_v49 = vld [vmem:[%s632_s4 + $0xc0] sm:$0xff] }
  0x25   : > { %275 = vst.msk [vmem:[%s651_s5 + $0x80] sm:$0xff] %vm258_vm0, %v242_v35  ;;  %276 = vst.msk [vmem:[%s651_s5 + $0x88] sm:$0xff] %vm258_vm0, %v243_v36  ;;  %v249_v48 = vmul.f32 %v634_v0, %v210_v45  ;;  %v212_v50 = vld [vmem:[%s632_s4 + $0xc8] sm:$0xff]  ;;  %v213_v51 = vld [vmem:[%s632_s4 + $0xd0] sm:$0xff]  ;;  %v250_v52 = vmul.f32 %v634_v0, %v211_v49 }
  0x26   : > { %277 = vst.msk [vmem:[%s651_s5 + $0x90] sm:$0xff] %vm258_vm0, %v244_v40  ;;  %278 = vst.msk [vmem:[%s651_s5 + $0x98] sm:$0xff] %vm258_vm0, %v245_v41  ;;  %v251_v53 = vmul.f32 %v634_v0, %v212_v50  ;;  %v252_v54 = vmul.f32 %v634_v0, %v213_v51  ;;  %v214_v55 = vld [vmem:[%s632_s4 + $0xd8] sm:$0xff]  ;;  %v215_v56 = vld [vmem:[%s632_s4 + $0xe0] sm:$0xff] }
  0x27   : > { %279 = vst.msk [vmem:[%s651_s5 + $0xa0] sm:$0xff] %vm258_vm0, %v246_v42  ;;  %v216_v57 = vld [vmem:[%s632_s4 + $0xe8] sm:$0xff]  ;;  %280 = vst.msk [vmem:[%s651_s5 + $0xa8] sm:$0xff] %vm258_vm0, %v247_v46  ;;  %v253_v58 = vmul.f32 %v634_v0, %v214_v55  ;;  %v254_v59 = vmul.f32 %v634_v0, %v215_v56  ;;  %v217_v61 = vld [vmem:[%s632_s4 + $0xf0] sm:$0xff] }
  0x28   : > { %281 = vst.msk [vmem:[%s651_s5 + $0xb0] sm:$0xff] %vm258_vm0, %v248_v47  ;;  %282 = vst.msk [vmem:[%s651_s5 + $0xb8] sm:$0xff] %vm258_vm0, %v249_v48  ;;  %v255_v60 = vmul.f32 %v634_v0, %v216_v57  ;;  %v218_v62 = vld [vmem:[%s632_s4 + $0xf8] sm:$0xff]  ;;  %v256_v63 = vmul.f32 %v634_v0, %v217_v61 }
  0x29   : > { %283 = vst.msk [vmem:[%s651_s5 + $0xc0] sm:$0xff] %vm258_vm0, %v250_v52  ;;  %284 = vst.msk [vmem:[%s651_s5 + $0xc8] sm:$0xff] %vm258_vm0, %v251_v53  ;;  %v257_v1 = vmul.f32 %v634_v0, %v218_v62 }
  0x2a   : > { %285 = vst.msk [vmem:[%s651_s5 + $0xd0] sm:$0xff] %vm258_vm0, %v252_v54  ;;  %286 = vst.msk [vmem:[%s651_s5 + $0xd8] sm:$0xff] %vm258_vm0, %v253_v58 }
  0x2b   : > { %287 = vst.msk [vmem:[%s651_s5 + $0xe0] sm:$0xff] %vm258_vm0, %v254_v59  ;;  %288 = vst.msk [vmem:[%s651_s5 + $0xe8] sm:$0xff] %vm258_vm0, %v255_v60 }
  0x2c   : > { %289 = vst.msk [vmem:[%s651_s5 + $0xf0] sm:$0xff] %vm258_vm0, %v256_v63  ;;  %290 = vst.msk [vmem:[%s651_s5 + $0xf8] sm:$0xff] %vm258_vm0, %v257_v1 }
  0x2d   : > { %481 = shalt.err (!%p478_p5)
}
  0x2e   : > { %s482_s23 = scalar_lea.hbm %s753_s15, 4096  ;;  %s486_s28 = scalar_lea.hbm %s825_s2, 8192 }
  0x2f   : > { %p483_p6 = scmp.ne.s32.totalorder %s753_s15, %s482_s23  ;;  %p487_p10 = scmp.lt.u32.totalorder %s753_s15, %s825_s2 }
  0x30   : > { %p488_p11 = scmp.lt.u32.totalorder %s486_s28, %s482_s23  ;;  %p490_p13 = scmp.lt.u32.totalorder %s482_s23, %s753_s15 }
  0x31   : > { %p484_p7 = pnand %p483_p6, %p606_p4 }
  0x32   : > { %p489_p12 = por %p488_p11, %p487_p10 }
  0x33   : > { %p485_p9 = pneg %p484_p7 }
  0x34   : > { %p491_p0 = por %p490_p13, %p489_p12 }
  0x36   : > { %p492_p1 = pnand %p491_p0, %p485_p9 }
  0x38   : > { %495 = shalt.err (!%p492_p1)
}
  0x39   : > { %s549_s3 = smov 128   ;;  %s550_s4 = smov 8  }
  0x3a   : > { %411 = dma.vmem_to_hbm [thread:$0]  (%p606_p4), %s755_s7, 4096, %s753_s15, %s777_s16, %s549_s3, %s549_s3, %s550_s4  }
  0x3b PF: > { %p417_p2 = scmp.ge.s32.totalorder %s546_s14, 2  ;;  %s322_s5 = sand.u32 1, %s526_s9  }
  0x3c   : > { %s323_s6 = scalar_lea.sflag [#allocation3], %s322_s5 }
  0x3d   : > { %p414_p3 = pnand %p417_p2, %p613_p8 }
  0x3f   : > { %521 = dma.done.wait (!%p414_p3), %s323_s6, 4096  }
  0x40   : > { %523 = vsyncadd (!%p414_p3), %s323_s6, 4294963200  ;;  %s15_s14 = sadd.s32 1, %s546_s14   ;;  %s828_s9 = smov %s530_s10 }
  0x41   : > { %p12_p5 = scmp.ge.s32.totalorder %s15_s14, 4   ;;  %s829_s10 = smov %s534_s11 }
  0x42   : > { %s830_s11 = smov %s619_s22  ;;  %s831_s12 = smov %s542_s13 }
  0x43   : > { %s832_s13 = smov %s834_s17  ;;  %14 = sbr.rel (!%p12_p5) target bundleno = 4 (0x4), region = 66 }
  0x4a   :  { %328 = vsyncpa [#allocation3], 1 }
  0x4b   :  { %330 = vsyncpa [#allocation3 + $0x1], 1 }

// kernel: se_block.4
= control target key start
LH: loop header
LB: loop body
LE: loop exit
PB: predicated region body
PF: predicated region fallthrough
CT: control target
= control target key end

     0   :  { %v292_v0 = vmov 0.0|0.0   ;;  %vm293_vm0 = vmmov 0   ;;  %v294_v4 = vmov 0.0   ;;  %v295_v5 = vmov 1966171168   ;;  %s359_s1 = inlined_call_operand.vmem [shape: f32[32,2], index: 1, kind: input, shape index: {}]   ;;  %s360_s0 = inlined_call_operand.vmem [shape: f32[2,1,32], index: 0, kind: input, shape index: {}]   ;;  %s361_s3 = inlined_call_operand.vmem [shape: f32[2,32], index: 3, kind: input, shape index: {}]   ;;  %s362_s2 = inlined_call_operand.vmem [shape: f32[1,2], index: 2, kind: input, shape index: {}]   ;;  %s363_s4 = inlined_call_operand.vmem [shape: f32[1,32], index: 4, kind: input, shape index: {}]   ;;  %s364_s5 = inlined_call_operand.vmem [shape: f32[2,1,32], index: 5, kind: output, shape index: {}]  }
   0x1   :  { %278 = vmatprep.subr.bf16.mxu0 %v292_v0  ;;  %v24_v1 = vld [vmem:[%s359_s1] sm:$0xff]  ;;  %v25_v2 = vld [vmem:[%s359_s1 + $0x8] sm:$0xff]  ;;  %v26_v3 = vld [vmem:[%s359_s1 + $0x10] sm:$0xff]  ;;  %270 = vmatprep.mubr.msk.f32.mxu0 %vm293_vm0, %v294_v4  ;;  %v39_v6 = vunpack.c.l.s4 %v295_v5  ;;  %v41_v7 = vlaneseq  ;;  %vm52_vm1 = vcmask 261120   ;;  %vm138_vm2 = vcmask 1041408  }
   0x2   :  { %v279_v8 = vpack.c.bf16 %v25_v2, %v24_v1  ;;  %v27_v9 = vld [vmem:[%s359_s1 + $0x18] sm:$0xff]  ;;  %v20_v10 = vld [vmem:[%s360_s0] sm:$0x1]  ;;  %v21_v11 = vld [vmem:[%s360_s0 + $0x1] sm:$0x1]  ;;  %273 = vmatprep.subr.mxu1 %v294_v4  ;;  %275 = vmatprep.mubr.msk.f32.mxu1 %vm293_vm0, %v294_v4  ;;  %vm134_vm3 = vcmask 15360  }
   0x3   :  { %v22_v12 = vmul.f32 0.00390625, %v20_v10  ;;  %v23_v13 = vmul.f32 0.00390625, %v21_v11  ;;  %v40_v14 = vunpack.c.0.s8 %v39_v6  ;;  %v282_v15 = vpack.c.bf16 %v27_v9, %v26_v3  ;;  %v126_v21 = vld [vmem:[%s361_s3] sm:$0x3] }
   0x4   :  { %280 = vmatpush3.bf16.msra.mxu0 %v279_v8  ;;  %v42_v16 = vshrl.u32 %v41_v7, 7  ;;  %274 = vmatpush3.msk.msra.mxu1 %vm138_vm2, %v126_v21  ;;  %v250_v22 = vld [vmem:[%s362_s2] ss:$0 sm:$0xff]  ;;  %vm243_vm4 = vcmask 253952  }
   0x5   :  { %281 = vmatprep.subr.bf16.mxu0 %v292_v0  ;;  %v37_v17 = vcombine.low %v22_v12, %v23_v13  ;;  %v252_v27 = vld [vmem:[%s363_s4] ss:$0 sm:$0xff] }
   0x6   :  { %v43_v18 = vsub.s32 %v40_v14, %v42_v16 }
   0x8   :  { %283 = vmatpush3.bf16.msra.mxu0 %v282_v15  ;;  %v44_v19 = vrot.slane %v37_v17, %v43_v18 }
   0xa   :  { %v51_v20 = vrot.slane %v44_v19, %v43_v18 }
   0xc   :  { %271 = vmatmul.mubr.msk.f32.vlgmr.msra.gmra.mrb[0].mxu0 %vm52_vm1, %v51_v20 }
  0xdf   :  { %v121_v23 = vpop.f32.mrb[0].mxu0 }
  0xe0   :  { %v122_v24 = vadd.f32 %v250_v22, %v121_v23  ;;  %v272_v25 = vpop.f32.mrb[1].mxu0 }
  0xe2   :  { %v125_v26 = vmax.f32 %v122_v24, 0.0 }
  0xe4   :  { %276 = vmatmul.mubr.msk.f32.vlgmr.msra.gmra.mrb[0].mxu1 %vm134_vm3, %v125_v26 }
 0x1b7   :  { %v208_v28 = vpop.f32.mrb[0].mxu1 }
 0x1b8   :  { %v209_v29 = vadd.f32 %v252_v27, %v208_v28  ;;  %v277_v30 = vpop.f32.mrb[1].mxu1 }
 0x1ba   :  { %v212_v31 = vsub.f32 0.0, %v209_v29 }
 0x1bc   :  { %v213_v32 = vmul.f32 1.442695, %v212_v31 }
 0x1be   :  { %288 = vpow2.f32 %v213_v32 }
 0x1c8   :  { %v289_v33 = vpop.eup %288 }
 0x1c9   :  { %v215_v34 = vadd.f32 1.0, %v289_v33 }
 0x1cb   :  { %290 = vrcp.f32 %v215_v34 }
 0x1d5   :  { %v291_v35 = vpop.eup %290 }
 0x1d6   :  { %v225_v36 = vrot.slane %v291_v35, %v43_v18 }
 0x1d8   :  { %v226_v37 = vcombine.high %v225_v36, %v225_v36  ;;  %v233_v38 = vrot.slane %v225_v36, %v43_v18 }
 0x1da   :  { %v240_v39 = vrot.slane %v226_v37, %v43_v18  ;;  %244 = vst.msk [vmem:[%s364_s5] sm:$0x1] %vm243_vm4, %v233_v38 }
 0x1dc   :  { %245 = vst.msk [vmem:[%s364_s5 + $0x1] sm:$0x1] %vm243_vm4, %v240_v39 }

</bundles_post_ra>
